<compile_context>
chip_gen: v7x
topology: tpu7x:2x2x1
jax: 0.10.0
libtpu: 0.0.40
codegen_flags: <defaults>
</compile_context>

<pallas_src>
import functools

import jax
import jax.numpy as jnp
from jax.experimental import pallas as pl
from jax.experimental.pallas import tpu as pltpu

IN_DIM = 12
OUT_DIM = 6
N_LAYERS = 6
PAD = 16          # each layer's weight block padded to [16, 16] (sublane-aligned)
LANE = 128


def _round_up(n, m):
    return ((n + m - 1) // m) * m


def _choose_tile(batch, max_tile, target_steps=4):
    """Batch tile: multiple of 128, capped, sized so padding waste < one tile."""
    tb = _round_up(max(1, -(-batch // target_steps)), LANE)
    return max(LANE, min(tb, max_tile))


def _mlp_kernel(x_ref, w_ref, b_ref, o_ref):
    """x_ref: [TB, 12]   w_ref: [6, 16, 16]   b_ref: [6, 16, 1]   o_ref: [6, TB].

    Layer k weight slab w_ref[k] holds W_k in its top-left [out_k, in_k] corner,
    zeros elsewhere, so activations can stay a fixed [16, TB] (batch on lanes)
    and the padded rows remain exactly zero through every ReLU.
    """
    x = x_ref[...]            # [TB, 12]  (batch on sublanes, as stored in HBM)
    w = w_ref[...]            # [6, 16, 16]
    b = b_ref[...]            # [6, 16, 1]

    # f32 parity with torch.nn.Linear (kernel is mem-bound, MXU cost irrelevant).
    prec = jax.lax.Precision.HIGHEST

    # Layer 0: contract x's feature axis so the result is already [16, TB]
    # (batch on lanes) -- no wrapper-side transpose / HBM round trip needed.
    h = jax.lax.dot_general(
        w[0, :, :IN_DIM], x,
        dimension_numbers=(((1,), (1,)), ((), ())),
        preferred_element_type=jnp.float32,
        precision=prec,
    )
    h = jnp.maximum(h + b[0], 0.0)                       # [16, TB]

    # Layers 1..4: relu(W @ h + b); padded rows/cols are zero and stay zero.
    for k in range(1, N_LAYERS - 1):
        h = jnp.dot(w[k], h, preferred_element_type=jnp.float32, precision=prec)
        h = jnp.maximum(h + b[k], 0.0)

    # Layer 5: no activation; keep only the 6 real output rows (lane-dense store).
    y = jnp.dot(w[N_LAYERS - 1], h,
                preferred_element_type=jnp.float32, precision=prec)
    y = y + b[N_LAYERS - 1]
    o_ref[...] = y[:OUT_DIM, :]


@functools.partial(jax.jit, static_argnames=("max_tile_b",))
def model_error_nn_forward(x, w_all, b_all, *, max_tile_b=16384):
    """x: [B, 12] f32.  w_all: [6,16,16] padded weight slabs.  b_all: [6,16,1]."""
    B = x.shape[0]
    x = x.astype(jnp.float32)

    tb = _choose_tile(B, max_tile_b)
    b_pad = _round_up(B, tb)
    grid = (b_pad // tb,)

    # Pad only if needed; waste is bounded to < one tile by _choose_tile.
    x_p = x if b_pad == B else jnp.pad(x, ((0, b_pad - B), (0, 0)))

    # VMEM budget derived from the chosen tile (the [tb,12] f32 input block is
    # lane-padded to 128 lanes in VMEM -> tb*512 B per buffer).
    vmem_bytes = (
        2 * tb * LANE * 4            # double-buffered [tb, 12] input blocks
        + 2 * 8 * tb * 4             # double-buffered [6->8, tb] output blocks
        + 8 * PAD * tb * 4           # headroom for [16, tb] f32 layer temporaries
        + 2 * N_LAYERS * PAD * LANE * 4   # resident weights + biases
    )
    vmem_limit = int(min(max(vmem_bytes + (4 << 20), 16 << 20), 48 << 20))

    out_t = pl.pallas_call(
        _mlp_kernel,
        out_shape=jax.ShapeDtypeStruct((OUT_DIM, b_pad), jnp.float32),
        grid=grid,
        in_specs=[
            # Activations: contiguous [tb, 12] row blocks straight from HBM.
            pl.BlockSpec((tb, IN_DIM), lambda i: (i, 0)),
            # Weights / biases: whole (tiny) arrays, VMEM-resident across steps.
            pl.BlockSpec((N_LAYERS, PAD, PAD), lambda i: (0, 0, 0)),
            pl.BlockSpec((N_LAYERS, PAD, 1), lambda i: (0, 0, 0)),
        ],
        # Lane-dense output (batch on lanes); tiny [6,B] transpose done outside.
        out_specs=pl.BlockSpec((OUT_DIM, tb), lambda i: (0, i)),
        compiler_params=pltpu.CompilerParams(
            dimension_semantics=("parallel",),     # shard batch across TCs (v7x)
            vmem_limit_bytes=vmem_limit,
        ),
    )(x_p, w_all, b_all)

    return jnp.transpose(out_t[:, :B])             # [B, 6]


def init_params(key):
    """nn.Linear-style init (uniform +/- 1/sqrt(fan_in)), PyTorch [out, in] layout."""
    dims = [(12, 12)] * 5 + [(6, 12)]              # (out, in)
    params = []
    for (fan_out, fan_in) in dims:
        key, kw, kb = jax.random.split(key, 3)
        bound = 1.0 / float(fan_in) ** 0.5
        w = jax.random.uniform(kw, (fan_out, fan_in), jnp.float32, -bound, bound)
        b = jax.random.uniform(kb, (fan_out,), jnp.float32, -bound, bound)
        params.append((w, b))
    return params


def pack_params(params):
    """Pack per-layer (W [out,in], b [out]) into zero-padded [6,16,16]/[6,16,1] slabs."""
    w_all = jnp.zeros((N_LAYERS, PAD, PAD), jnp.float32)
    b_all = jnp.zeros((N_LAYERS, PAD, 1), jnp.float32)
    for k, (w, b) in enumerate(params):
        fo, fi = w.shape
        w_all = w_all.at[k, :fo, :fi].set(w)
        b_all = b_all.at[k, :fo, 0].set(b)
    return w_all, b_all


def reference_forward(x, params):
    h = x.astype(jnp.float32)
    for k, (w, b) in enumerate(params):
        h = jnp.dot(h, w.T, precision=jax.lax.Precision.HIGHEST) + b
        if k < N_LAYERS - 1:
            h = jnp.maximum(h, 0.0)
    return h


if __name__ == "__main__":
    key = jax.random.PRNGKey(0)
    key, kx = jax.random.split(key)
    batch = 8
    x = jax.random.normal(kx, (batch, IN_DIM), jnp.float32)

    params = init_params(key)
    w_all, b_all = pack_params(params)

    out = model_error_nn_forward(x, w_all, b_all)
    out = jax.block_until_ready(out)

    ref = reference_forward(x, params)
    assert out.shape == (batch, OUT_DIM), out.shape
    assert jnp.allclose(out, ref, atol=1e-5, rtol=1e-5), "mismatch vs reference"

    print("KERNEL_OK")
</pallas_src>

<mosaic_0001>
module attributes {stable_mosaic.version = 11 : i64} {
  func.func @_mlp_kernel(%arg0: i32, %arg1: memref<128x12xf32, #tpu.memory_space<vmem>>, %arg2: memref<6x16x16xf32, #tpu.memory_space<vmem>>, %arg3: memref<6x16x1xf32, #tpu.memory_space<vmem>>, %arg4: memref<6x128xf32, #tpu.memory_space<vmem>>) attributes {dimension_semantics = [#tpu.dimension_semantics<parallel>], iteration_bounds = array<i64: 1>, scalar_prefetch = 0 : i64, scratch_operands = 0 : i64, tpu.core_type = #tpu.core_type<tc>, window_params = [{transform_indices = @transform_0, window_bounds = array<i64: 128, 12>}, {pipeline_mode = #tpu.pipeline_mode<synchronous>, transform_indices = @transform_1, window_bounds = array<i64: 6, 16, 16>}, {pipeline_mode = #tpu.pipeline_mode<synchronous>, transform_indices = @transform_2, window_bounds = array<i64: 6, 16, 1>}, {transform_indices = @transform_3, window_bounds = array<i64: 6, 128>}]} {
    %c0 = arith.constant 0 : index
    %c0_0 = arith.constant 0 : index
    %0 = vector.load %arg1[%c0, %c0_0] : memref<128x12xf32, #tpu.memory_space<vmem>>, vector<128x12xf32>
    %c0_1 = arith.constant 0 : index
    %c0_2 = arith.constant 0 : index
    %c0_3 = arith.constant 0 : index
    %1 = vector.load %arg2[%c0_1, %c0_2, %c0_3] : memref<6x16x16xf32, #tpu.memory_space<vmem>>, vector<6x16x16xf32>
    %c0_4 = arith.constant 0 : index
    %c0_5 = arith.constant 0 : index
    %c0_6 = arith.constant 0 : index
    %2 = vector.load %arg3[%c0_4, %c0_5, %c0_6] : memref<6x16x1xf32, #tpu.memory_space<vmem>>, vector<6x16x1xf32>
    %3 = vector.extract_strided_slice %1 {offsets = [0, 0, 0], sizes = [1, 16, 12], strides = [1, 1, 1]} : vector<6x16x16xf32> to vector<1x16x12xf32>
    %4 = vector.shape_cast %3 : vector<1x16x12xf32> to vector<16x12xf32>
    %cst = arith.constant dense<0.000000e+00> : vector<16x128xf32>
    %5 = tpu.matmul %4, %0, %cst {dimension_numbers = #tpu.dot_dimension_numbers<[1], [1], [0], [0], [0, 0, 1, 0], [], []>, precision = #tpu.contract_precision<fp32>} : vector<16x12xf32>, vector<128x12xf32>, vector<16x128xf32> -> vector<16x128xf32>
    %6 = vector.extract_strided_slice %2 {offsets = [0, 0, 0], sizes = [1, 16, 1], strides = [1, 1, 1]} : vector<6x16x1xf32> to vector<1x16x1xf32>
    %7 = vector.shape_cast %6 : vector<1x16x1xf32> to vector<16x1xf32>
    %8 = vector.broadcast %7 : vector<16x1xf32> to vector<16x128xf32>
    %9 = arith.addf %5, %8 : vector<16x128xf32>
    %cst_7 = arith.constant 0.000000e+00 : f32
    %10 = vector.broadcast %cst_7 : f32 to vector<16x128xf32>
    %11 = arith.maximumf %9, %10 : vector<16x128xf32>
    %12 = vector.extract_strided_slice %1 {offsets = [1, 0, 0], sizes = [1, 16, 16], strides = [1, 1, 1]} : vector<6x16x16xf32> to vector<1x16x16xf32>
    %13 = vector.shape_cast %12 : vector<1x16x16xf32> to vector<16x16xf32>
    %cst_8 = arith.constant dense<0.000000e+00> : vector<16x128xf32>
    %14 = tpu.matmul %13, %11, %cst_8 {dimension_numbers = #tpu.dot_dimension_numbers<[1], [0], [0], [1], [0, 0, 1, 1], [], []>, precision = #tpu.contract_precision<fp32>} : vector<16x16xf32>, vector<16x128xf32>, vector<16x128xf32> -> vector<16x128xf32>
    %15 = vector.extract_strided_slice %2 {offsets = [1, 0, 0], sizes = [1, 16, 1], strides = [1, 1, 1]} : vector<6x16x1xf32> to vector<1x16x1xf32>
    %16 = vector.shape_cast %15 : vector<1x16x1xf32> to vector<16x1xf32>
    %17 = vector.broadcast %16 : vector<16x1xf32> to vector<16x128xf32>
    %18 = arith.addf %14, %17 : vector<16x128xf32>
    %cst_9 = arith.constant 0.000000e+00 : f32
    %19 = vector.broadcast %cst_9 : f32 to vector<16x128xf32>
    %20 = arith.maximumf %18, %19 : vector<16x128xf32>
    %21 = vector.extract_strided_slice %1 {offsets = [2, 0, 0], sizes = [1, 16, 16], strides = [1, 1, 1]} : vector<6x16x16xf32> to vector<1x16x16xf32>
    %22 = vector.shape_cast %21 : vector<1x16x16xf32> to vector<16x16xf32>
    %cst_10 = arith.constant dense<0.000000e+00> : vector<16x128xf32>
    %23 = tpu.matmul %22, %20, %cst_10 {dimension_numbers = #tpu.dot_dimension_numbers<[1], [0], [0], [1], [0, 0, 1, 1], [], []>, precision = #tpu.contract_precision<fp32>} : vector<16x16xf32>, vector<16x128xf32>, vector<16x128xf32> -> vector<16x128xf32>
    %24 = vector.extract_strided_slice %2 {offsets = [2, 0, 0], sizes = [1, 16, 1], strides = [1, 1, 1]} : vector<6x16x1xf32> to vector<1x16x1xf32>
    %25 = vector.shape_cast %24 : vector<1x16x1xf32> to vector<16x1xf32>
    %26 = vector.broadcast %25 : vector<16x1xf32> to vector<16x128xf32>
    %27 = arith.addf %23, %26 : vector<16x128xf32>
    %cst_11 = arith.constant 0.000000e+00 : f32
    %28 = vector.broadcast %cst_11 : f32 to vector<16x128xf32>
    %29 = arith.maximumf %27, %28 : vector<16x128xf32>
    %30 = vector.extract_strided_slice %1 {offsets = [3, 0, 0], sizes = [1, 16, 16], strides = [1, 1, 1]} : vector<6x16x16xf32> to vector<1x16x16xf32>
    %31 = vector.shape_cast %30 : vector<1x16x16xf32> to vector<16x16xf32>
    %cst_12 = arith.constant dense<0.000000e+00> : vector<16x128xf32>
    %32 = tpu.matmul %31, %29, %cst_12 {dimension_numbers = #tpu.dot_dimension_numbers<[1], [0], [0], [1], [0, 0, 1, 1], [], []>, precision = #tpu.contract_precision<fp32>} : vector<16x16xf32>, vector<16x128xf32>, vector<16x128xf32> -> vector<16x128xf32>
    %33 = vector.extract_strided_slice %2 {offsets = [3, 0, 0], sizes = [1, 16, 1], strides = [1, 1, 1]} : vector<6x16x1xf32> to vector<1x16x1xf32>
    %34 = vector.shape_cast %33 : vector<1x16x1xf32> to vector<16x1xf32>
    %35 = vector.broadcast %34 : vector<16x1xf32> to vector<16x128xf32>
    %36 = arith.addf %32, %35 : vector<16x128xf32>
    %cst_13 = arith.constant 0.000000e+00 : f32
    %37 = vector.broadcast %cst_13 : f32 to vector<16x128xf32>
    %38 = arith.maximumf %36, %37 : vector<16x128xf32>
    %39 = vector.extract_strided_slice %1 {offsets = [4, 0, 0], sizes = [1, 16, 16], strides = [1, 1, 1]} : vector<6x16x16xf32> to vector<1x16x16xf32>
    %40 = vector.shape_cast %39 : vector<1x16x16xf32> to vector<16x16xf32>
    %cst_14 = arith.constant dense<0.000000e+00> : vector<16x128xf32>
    %41 = tpu.matmul %40, %38, %cst_14 {dimension_numbers = #tpu.dot_dimension_numbers<[1], [0], [0], [1], [0, 0, 1, 1], [], []>, precision = #tpu.contract_precision<fp32>} : vector<16x16xf32>, vector<16x128xf32>, vector<16x128xf32> -> vector<16x128xf32>
    %42 = vector.extract_strided_slice %2 {offsets = [4, 0, 0], sizes = [1, 16, 1], strides = [1, 1, 1]} : vector<6x16x1xf32> to vector<1x16x1xf32>
    %43 = vector.shape_cast %42 : vector<1x16x1xf32> to vector<16x1xf32>
    %44 = vector.broadcast %43 : vector<16x1xf32> to vector<16x128xf32>
    %45 = arith.addf %41, %44 : vector<16x128xf32>
    %cst_15 = arith.constant 0.000000e+00 : f32
    %46 = vector.broadcast %cst_15 : f32 to vector<16x128xf32>
    %47 = arith.maximumf %45, %46 : vector<16x128xf32>
    %48 = vector.extract_strided_slice %1 {offsets = [5, 0, 0], sizes = [1, 16, 16], strides = [1, 1, 1]} : vector<6x16x16xf32> to vector<1x16x16xf32>
    %49 = vector.shape_cast %48 : vector<1x16x16xf32> to vector<16x16xf32>
    %cst_16 = arith.constant dense<0.000000e+00> : vector<16x128xf32>
    %50 = tpu.matmul %49, %47, %cst_16 {dimension_numbers = #tpu.dot_dimension_numbers<[1], [0], [0], [1], [0, 0, 1, 1], [], []>, precision = #tpu.contract_precision<fp32>} : vector<16x16xf32>, vector<16x128xf32>, vector<16x128xf32> -> vector<16x128xf32>
    %51 = vector.extract_strided_slice %2 {offsets = [5, 0, 0], sizes = [1, 16, 1], strides = [1, 1, 1]} : vector<6x16x1xf32> to vector<1x16x1xf32>
    %52 = vector.shape_cast %51 : vector<1x16x1xf32> to vector<16x1xf32>
    %53 = vector.broadcast %52 : vector<16x1xf32> to vector<16x128xf32>
    %54 = arith.addf %50, %53 : vector<16x128xf32>
    %55 = vector.extract_strided_slice %54 {offsets = [0, 0], sizes = [6, 128], strides = [1, 1]} : vector<16x128xf32> to vector<6x128xf32>
    %c0_17 = arith.constant 0 : index
    %c0_18 = arith.constant 0 : index
    %56 = vector.load %arg4[%c0_17, %c0_18] : memref<6x128xf32, #tpu.memory_space<vmem>>, vector<6x128xf32>
    tpu.vector_store %arg4[%c0_17, %c0_18], %55 {strides = array<i32>} : memref<6x128xf32, #tpu.memory_space<vmem>>, vector<6x128xf32>,
    return
  }
  func.func @transform_0(%arg0: i32) -> (i32, i32) {
    %c0_i32 = arith.constant 0 : i32
    %c0_i32_0 = arith.constant 0 : i32
    return %arg0, %c0_i32 : i32, i32
  }
  func.func @transform_1(%arg0: i32) -> (i32, i32, i32) {
    %c0_i32 = arith.constant 0 : i32
    %c0_i32_0 = arith.constant 0 : i32
    %c0_i32_1 = arith.constant 0 : i32
    %c0_i32_2 = arith.constant 0 : i32
    return %c0_i32, %c0_i32_0, %c0_i32_1 : i32, i32, i32
  }
  func.func @transform_2(%arg0: i32) -> (i32, i32, i32) {
    %c0_i32 = arith.constant 0 : i32
    %c0_i32_0 = arith.constant 0 : i32
    %c0_i32_1 = arith.constant 0 : i32
    %c0_i32_2 = arith.constant 0 : i32
    return %c0_i32, %c0_i32_0, %c0_i32_1 : i32, i32, i32
  }
  func.func @transform_3(%arg0: i32) -> (i32, i32) {
    %c0_i32 = arith.constant 0 : i32
    %c0_i32_0 = arith.constant 0 : i32
    return %c0_i32, %arg0 : i32, i32
  }
}

</mosaic_0001>

<bundles_post_ra>
// kernel: model_error_nn_forward.1
= control target key start
LH: loop header
LB: loop body
LE: loop exit
PB: predicated region body
PF: predicated region fallthrough
CT: control target
= control target key end

     0   :  { %vm64_vm0 = vcmask 97280   ;;  %vm815_vm1 = vcmask 130048   ;;  %s4881_s0 = inlined_call_operand.vmem [shape: f32[128,12], index: 0, kind: input, shape index: {}]   ;;  %s4882_s1 = inlined_call_operand.vmem [shape: f32[6,16,16], index: 1, kind: input, shape index: {}]   ;;  %s4883_s2 = inlined_call_operand.vmem [shape: f32[6,16,1], index: 2, kind: input, shape index: {}]   ;;  %s4884_s3 = inlined_call_operand.vmem [shape: f32[6,128], index: 3, kind: output, shape index: {}]  }
   0x1   :  { %v14_v0 = vld [vmem:[%s4881_s0] sm:$0xff]  ;;  %v15_v1 = vld [vmem:[%s4881_s0 + $0x8] sm:$0xff]  ;;  %v16_v2 = vld [vmem:[%s4881_s0 + $0x10] sm:$0xff] }
   0x2   :  { %v72_v3 = vsel %vm64_vm0, %v14_v0, 0  ;;  %v75_v4 = vsel %vm64_vm0, %v15_v1, 0  ;;  %v17_v5 = vld [vmem:[%s4881_s0 + $0x18] sm:$0xff]  ;;  %v78_v6 = vsel %vm64_vm0, %v16_v2, 0  ;;  %v18_v7 = vld [vmem:[%s4881_s0 + $0x20] sm:$0xff]  ;;  %v19_v8 = vld [vmem:[%s4881_s0 + $0x28] sm:$0xff] }
   0x3   :  { %v120_v9 = vand.u32 4294901760, %v72_v3  ;;  %v123_v10 = vand.u32 4294901760, %v75_v4  ;;  %v81_v11 = vsel %vm64_vm0, %v17_v5, 0  ;;  %v126_v12 = vand.u32 4294901760, %v78_v6  ;;  %v20_v26 = vld [vmem:[%s4881_s0 + $0x30] sm:$0xff]  ;;  %v21_v27 = vld [vmem:[%s4881_s0 + $0x38] sm:$0xff] }
   0x4   :  { %v129_v13 = vand.u32 4294901760, %v81_v11  ;;  %v84_v14 = vsel %vm64_vm0, %v18_v7, 0  ;;  %v87_v15 = vsel %vm64_vm0, %v19_v8, 0  ;;  %v90_v30 = vsel %vm64_vm0, %v20_v26, 0  ;;  %v30_v32 = vld [vmem:[%s4882_s1] sm:$0xff]  ;;  %v23_v39 = vld [vmem:[%s4881_s0 + $0x48] sm:$0xff] }
   0x5   :  { %v4481_v16 = vpack.c.bf16 %v123_v10, %v120_v9  ;;  %v4483_v17 = vsub.f32 %v72_v3, %v120_v9  ;;  %v4485_v18 = vsub.f32 %v75_v4, %v123_v10  ;;  %v4487_v19 = vsub.f32 %v78_v6, %v126_v12  ;;  %v22_v38 = vld [vmem:[%s4881_s0 + $0x40] sm:$0xff]  ;;  %v24_v60 = vld [vmem:[%s4881_s0 + $0x50] sm:$0xff]  ;;  %v25_v61 = vld [vmem:[%s4881_s0 + $0x58] sm:$0xff] }
   0x6   :  { %v4489_v20 = vpack.c.bf16 %v129_v13, %v126_v12  ;;  %v4491_v21 = vsub.f32 %v81_v11, %v129_v13  ;;  %v132_v23 = vand.u32 4294901760, %v84_v14  ;;  %v135_v24 = vand.u32 4294901760, %v87_v15  ;;  %v26_v13 = vld [vmem:[%s4881_s0 + $0x60] sm:$0xff] }
   0x7   :  { %v4114_v22 = vpack.c.bf16 %v4485_v18, %v4483_v17  ;;  %4051 = vmatprep.subr.bf16.mxu1 %v4481_v16  ;;  %v93_v31 = vsel %vm64_vm0, %v21_v27, 0  ;;  %v138_v34 = vand.u32 4294901760, %v90_v30  ;;  %v66_v37 = vsel %vm64_vm0, %v30_v32, 0 }
   0x8   :  { %v4118_v25 = vpack.c.bf16 %v4491_v21, %v4487_v19  ;;  %4053 = vmatpush3.bf16.xpose.msra.mxu1 %v4481_v16  ;;  %v4506_v28 = vsub.f32 %v84_v14, %v132_v23  ;;  %v4508_v29 = vsub.f32 %v87_v15, %v135_v24  ;;  %v4515_v33 = vpack.c.bf16 %v135_v24, %v132_v23  ;;  %v27_v14 = vld [vmem:[%s4881_s0 + $0x68] sm:$0xff] }
   0x9   :  { %4115 = vmatprep.subr.bf16.mxu0 %v4114_v22  ;;  %4055 = vmatprep.subr.bf16.mxu1 %v4489_v20  ;;  %v141_v35 = vand.u32 4294901760, %v93_v31  ;;  %v4527_v40 = vand.u32 4294901760, %v66_v37  ;;  %v4530_v41 = vsub.f32 %v90_v30, %v138_v34  ;;  %v223_v43 = vand.u32 4294901760, %v4483_v17 }
   0xa   :  { %4117 = vmatpush3.bf16.xpose.msra.mxu0 %v4114_v22  ;;  %v4122_v36 = vpack.c.bf16 %v4508_v29, %v4506_v28  ;;  %v230_v44 = vand.u32 4294901760, %v4485_v18  ;;  %v96_v45 = vsel %vm64_vm0, %v22_v38, 0  ;;  %v99_v46 = vsel %vm64_vm0, %v23_v39, 0 }
   0xb   :  { %4119 = vmatprep.subr.bf16.mxu0 %v4118_v25  ;;  %v4532_v42 = vsub.f32 %v93_v31, %v141_v35  ;;  %v4539_v47 = vsub.f32 %v66_v37, %v4527_v40  ;;  %v4547_v49 = vpack.c.bf16 %v141_v35, %v138_v34  ;;  %v237_v51 = vand.u32 4294901760, %v4487_v19  ;;  %v28_v35 = vld [vmem:[%s4881_s0 + $0x70] sm:$0xff] }
   0xc   :  { %v4545_v48 = vpack.c.bf16 %v230_v44, %v223_v43  ;;  %v244_v52 = vand.u32 4294901760, %v4491_v21  ;;  %v144_v54 = vand.u32 4294901760, %v96_v45  ;;  %v147_v55 = vand.u32 4294901760, %v99_v46 }
   0xd   :  { %3732 = vmatprep.mubr.f32.mxu0 %v4539_v47  ;;  %v202_v50 = vand.u32 4294901760, %v4539_v47  ;;  %v4126_v53 = vpack.c.bf16 %v4532_v42, %v4530_v41  ;;  %v251_v58 = vand.u32 4294901760, %v4506_v28  ;;  %v258_v59 = vand.u32 4294901760, %v4508_v29 }
   0xe   :  { %v4562_v57 = vpack.c.bf16 %v244_v52, %v237_v51  ;;  %v265_v0 = vand.u32 4294901760, %v4530_v41  ;;  %v272_v1 = vand.u32 4294901760, %v4532_v42  ;;  %v4582_v2 = vsub.f32 %v96_v45, %v144_v54 }
   0xf   :  { %v203_v56 = vsub.f32 %v4539_v47, %v202_v50  ;;  %v4578_v63 = vpack.c.bf16 %v258_v59, %v251_v58  ;;  %v4584_v3 = vsub.f32 %v99_v46, %v147_v55  ;;  %v102_v4 = vsel %vm64_vm0, %v24_v60, 0  ;;  %v31_v60 = vld [vmem:[%s4882_s1 + $0x8] sm:$0xff] }
  0x10   :  { %4057 = vmatpush3.bf16.xpose.msra.mxu1 %v4489_v20  ;;  %v105_v5 = vsel %vm64_vm0, %v25_v61, 0  ;;  %v4592_v6 = vpack.c.bf16 %v272_v1, %v265_v0  ;;  %v4594_v7 = vpack.c.bf16 %v147_v55, %v144_v54  ;;  %v150_v9 = vand.u32 4294901760, %v102_v4 }
  0x11   :  { %4059 = vmatprep.subr.bf16.mxu1 %v4515_v33  ;;  %v204_v62 = vand.u32 4294901760, %v203_v56  ;;  %v4130_v8 = vpack.c.bf16 %v4584_v3, %v4582_v2  ;;  %v153_v10 = vand.u32 4294901760, %v105_v5  ;;  %v279_v11 = vand.u32 4294901760, %v4582_v2 }
  0x12   :  { %4121 = vmatpush3.bf16.xpose.msra.mxu0 %v4118_v25  ;;  %v286_v12 = vand.u32 4294901760, %v4584_v3  ;;  %v4614_v22 = vsub.f32 %v102_v4, %v150_v9  ;;  %v108_v24 = vsel %vm64_vm0, %v26_v13, 0  ;;  %v111_v25 = vsel %vm64_vm0, %v27_v14, 0 }
  0x13   :  { %4123 = vmatprep.subr.bf16.mxu0 %v4122_v36  ;;  %3662 = vmatprep.mubr.f32.mxu1 %v204_v62  ;;  %v4616_v23 = vsub.f32 %v105_v5, %v153_v10  ;;  %v4620_v26 = vpack.c.bf16 %v153_v10, %v150_v9  ;;  %v156_v30 = vand.u32 4294901760, %v108_v24  ;;  %v159_v31 = vand.u32 4294901760, %v111_v25 }
  0x14   :  { %v4612_v15 = vpack.c.bf16 %v286_v12, %v279_v11  ;;  %v293_v32 = vand.u32 4294901760, %v4614_v22  ;;  %v114_v45 = vsel %vm64_vm0, %v28_v35, 0  ;;  %v69_v4 = vsel %vm64_vm0, %v31_v60, 0 }
  0x15   :  { %v4134_v27 = vpack.c.bf16 %v4616_v23, %v4614_v22  ;;  %v300_v34 = vand.u32 4294901760, %v4616_v23  ;;  %v4640_v38 = vsub.f32 %v108_v24, %v156_v30  ;;  %v4642_v39 = vsub.f32 %v111_v25, %v159_v31 }
  0x16   :  { %v162_v55 = vand.u32 4294901760, %v114_v45  ;;  %v4670_v13 = vand.u32 4294901760, %v69_v4  ;;  %v224_v14 = vsub.f32 %v4483_v17, %v223_v43  ;;  %v231_v24 = vsub.f32 %v4485_v18, %v230_v44 }
  0x17   :  { %v4638_v37 = vpack.c.bf16 %v300_v34, %v293_v32  ;;  %v4138_v54 = vpack.c.bf16 %v4642_v39, %v4640_v38  ;;  %v307_v61 = vand.u32 4294901760, %v4640_v38  ;;  %v314_v62 = vand.u32 4294901760, %v4642_v39 }
  0x18   :  { %4061 = vmatpush3.bf16.xpose.msra.mxu1 %v4515_v33  ;;  %v225_v35 = vand.u32 4294901760, %v224_v14  ;;  %v232_v17 = vand.u32 4294901760, %v231_v24  ;;  %v294_v14 = vsub.f32 %v4614_v22, %v293_v32 }
  0x19   :  { %4063 = vmatprep.subr.bf16.mxu1 %v4547_v49  ;;  %v4662_v5 = vpack.c.bf16 %v314_v62, %v307_v61  ;;  %v308_v24 = vsub.f32 %v4640_v38, %v307_v61  ;;  %v315_v22 = vsub.f32 %v4642_v39, %v314_v62 }
  0x1a   :  { %4125 = vmatpush3.bf16.xpose.msra.mxu0 %v4122_v36  ;;  %v29_v36 = vld [vmem:[%s4881_s0 + $0x78] sm:$0xff]  ;;  %v4082_v44 = vpack.c.bf16 %v232_v17, %v225_v35 }
  0x1b   :  { %4127 = vmatprep.subr.bf16.mxu0 %v4126_v53  ;;  %v117_v46 = vsel %vm64_vm0, %v29_v36, 0  ;;  %v238_v36 = vsub.f32 %v4487_v19, %v237_v51  ;;  %v252_v19 = vsub.f32 %v4506_v28, %v251_v58  ;;  %v273_v58 = vsub.f32 %v4532_v42, %v272_v1 }
  0x1c   :  { %v165_v56 = vand.u32 4294901760, %v117_v46  ;;  %v316_v32 = vand.u32 4294901760, %v315_v22 }
  0x1d   :  { %v253_v51 = vand.u32 4294901760, %v252_v19 }
  0x1e   :  { %v4666_v9 = vsub.f32 %v117_v46, %v165_v56  ;;  %v4668_v10 = vpack.c.bf16 %v165_v56, %v162_v55 }
  0x20   :  { %4065 = vmatpush3.bf16.xpose.msra.mxu1 %v4547_v49 }
  0x21   :  { %4067 = vmatprep.subr.bf16.mxu1 %v4594_v7 }
  0x22   :  { %4129 = vmatpush3.bf16.xpose.msra.mxu0 %v4126_v53  ;;  %v4646_v53 = vpack.c.bf16 %v159_v31, %v156_v30  ;;  %v328_v30 = vand.u32 4294901760, %v4666_v9  ;;  %v4684_v31 = vsub.f32 %v69_v4, %v4670_v13  ;;  %v274_v4 = vand.u32 4294901760, %v273_v58 }
  0x23   :  { %4131 = vmatprep.subr.bf16.mxu0 %v4130_v8 }
  0x24   :  { %v212_v43 = vand.u32 4294901760, %v4684_v31  ;;  %v329_v38 = vsub.f32 %v4666_v9, %v328_v30 }
  0x26   :  { %v213_v46 = vsub.f32 %v4684_v31, %v212_v43  ;;  %v330_v61 = vand.u32 4294901760, %v329_v38 }
  0x28   :  { %4069 = vmatpush3.bf16.xpose.msra.mxu1 %v4594_v7  ;;  %v214_v56 = vand.u32 4294901760, %v213_v46 }
  0x29   :  { %4071 = vmatprep.subr.bf16.mxu1 %v4620_v26 }
  0x2a   :  { %4133 = vmatpush3.bf16.xpose.msra.mxu0 %v4130_v8  ;;  %v4664_v8 = vsub.f32 %v114_v45, %v162_v55  ;;  %v245_v45 = vsub.f32 %v4491_v21, %v244_v52  ;;  %v259_v21 = vsub.f32 %v4508_v29, %v258_v59  ;;  %v266_v29 = vsub.f32 %v4530_v41, %v265_v0 }
  0x2b   :  { %4135 = vmatprep.subr.bf16.mxu0 %v4134_v27  ;;  %v287_v41 = vsub.f32 %v4584_v3, %v286_v12  ;;  %v295_v3 = vand.u32 4294901760, %v294_v14 }
  0x2c   :  { %v4142_v25 = vpack.c.bf16 %v4666_v9, %v4664_v8  ;;  %v246_v55 = vand.u32 4294901760, %v245_v45  ;;  %v260_v52 = vand.u32 4294901760, %v259_v21  ;;  %v267_v59 = vand.u32 4294901760, %v266_v29 }
  0x2d   :  { %v288_v0 = vand.u32 4294901760, %v287_v41  ;;  %v4436_v9 = vmov 0  }
  0x2e   :  { %v4090_v28 = vpack.c.bf16 %v260_v52, %v253_v51  ;;  %v4094_v47 = vpack.c.bf16 %v274_v4, %v267_v59  ;;  %4434 = vset.pattern.permute.xlu0 %v4436_v9  ;;  %4435 = vset.pattern.permute.xlu1 %v4436_v9 }
  0x30   :  { %4073 = vmatpush3.bf16.xpose.msra.mxu1 %v4620_v26 }
  0x31   :  { %4075 = vmatprep.subr.bf16.mxu1 %v4646_v53 }
  0x32   :  { %4137 = vmatpush3.bf16.xpose.msra.mxu0 %v4134_v27  ;;  %v321_v27 = vand.u32 4294901760, %v4664_v8 }
  0x33   :  { %4139 = vmatprep.subr.bf16.mxu0 %v4138_v54 }
  0x34   :  { %v4691_v18 = vpack.c.bf16 %v328_v30, %v321_v27  ;;  %v48_v30 = vld [vmem:[%s4883_s2 + $0x30] sm:$0xff] }
  0x38   :  { %4077 = vmatpush3.bf16.xpose.msra.mxu1 %v4646_v53 }
  0x39   :  { %4079 = vmatprep.subr.bf16.mxu1 %v4668_v10 }
  0x3a   :  { %4141 = vmatpush3.bf16.xpose.msra.mxu0 %v4138_v54  ;;  %v239_v54 = vand.u32 4294901760, %v238_v36 }
  0x3b   :  { %4143 = vmatprep.subr.bf16.mxu0 %v4142_v25 }
  0x3c   :  { %v4086_v60 = vpack.c.bf16 %v246_v55, %v239_v54 }
  0x40   :  { %4081 = vmatpush3.bf16.xpose.msra.mxu1 %v4668_v10 }
  0x41   :  { %4083 = vmatprep.subr.bf16.mxu1 %v4082_v44 }
  0x42   :  { %4145 = vmatpush3.bf16.xpose.msra.mxu0 %v4142_v25  ;;  %v322_v25 = vsub.f32 %v4664_v8, %v321_v27  ;;  %v42_v8 = vld [vmem:[%s4883_s2] sm:$0xff]  ;;  %v43_v27 = vld [vmem:[%s4883_s2 + $0x8] sm:$0xff] }
  0x43   :  { %4147 = vmatprep.subr.bf16.mxu0 %v4481_v16  ;;  %56 = vperm.xlu0 %4434, %v42_v8  }
  0x44   :  { %v323_v39 = vand.u32 4294901760, %v322_v25  ;;  %v35_v25 = vld [vmem:[%s4882_s1 + $0x28] sm:$0xff] }
  0x45   :  { %v1340_v38 = vsel %vm815_vm1, %v35_v25, 0 }
  0x46   :  { %v4110_v62 = vpack.c.bf16 %v330_v61, %v323_v39  ;;  %v1419_v61 = vand.u32 4294901760, %v1340_v38 }
  0x47   :  { %3663 = vmatmul.mubr.f32.vlgmr.msra.gmra.mrb[0].mxu1 %v214_v56  ;;  %61 = vperm.xlu0 %4434, %v43_v27  }
  0x48   :  { %4085 = vmatpush3.bf16.xpose.msra.mxu1 %v4082_v44  ;;  %3697 = vmatprep.mubr.f32.mxu1 %v4527_v40 }
  0x49   :  { %3733 = vmatmul.mubr.f32.vlgmr.msra.gmra.mrb[0].mxu0 %v4684_v31  ;;  %4087 = vmatprep.subr.bf16.mxu1 %v4086_v60  ;;  %v50_v31 = vld [vmem:[%s4883_s2 + $0x40] sm:$0xff] }
  0x4a   :  { %4149 = vmatpush3.bf16.xpose.msra.mxu0 %v4481_v16  ;;  %3767 = vmatprep.mubr.f32.mxu0 %v202_v50  ;;  %v280_v50 = vsub.f32 %v4582_v2, %v279_v11  ;;  %v301_v2 = vsub.f32 %v4616_v23, %v300_v34  ;;  %v309_v23 = vand.u32 4294901760, %v308_v24 }
  0x4b   :  { %4151 = vmatprep.subr.bf16.mxu0 %v4489_v20 }
  0x4c   :  { %v281_v42 = vand.u32 4294901760, %v280_v50  ;;  %v302_v11 = vand.u32 4294901760, %v301_v2  ;;  %v4106_v34 = vpack.c.bf16 %v316_v32, %v309_v23 }
  0x4e   :  { %v4098_v1 = vpack.c.bf16 %v288_v0, %v281_v42  ;;  %v4102_v12 = vpack.c.bf16 %v302_v11, %v295_v3  ;;  %v34_v11 = vld [vmem:[%s4882_s1 + $0x20] sm:$0xff] }
  0x50   :  { %4089 = vmatpush3.bf16.xpose.msra.mxu1 %v4086_v60 }
  0x51   :  { %4091 = vmatprep.subr.bf16.mxu1 %v4090_v28 }
  0x52   :  { %4153 = vmatpush3.bf16.xpose.msra.mxu0 %v4489_v20 }
  0x53   :  { %4155 = vmatprep.subr.bf16.mxu0 %v4515_v33 }
  0x58   :  { %4093 = vmatpush3.bf16.xpose.msra.mxu1 %v4090_v28 }
  0x59   :  { %4095 = vmatprep.subr.bf16.mxu1 %v4094_v47 }
  0x5a   :  { %4157 = vmatpush3.bf16.xpose.msra.mxu0 %v4515_v33 }
  0x5b   :  { %4159 = vmatprep.subr.bf16.mxu0 %v4547_v49 }
  0x60   :  { %4097 = vmatpush3.bf16.xpose.msra.mxu1 %v4094_v47 }
  0x61   :  { %4099 = vmatprep.subr.bf16.mxu1 %v4098_v1 }
  0x62   :  { %4161 = vmatpush3.bf16.xpose.msra.mxu0 %v4547_v49 }
  0x63   :  { %4163 = vmatprep.subr.bf16.mxu0 %v4594_v7 }
  0x68   :  { %4101 = vmatpush3.bf16.xpose.msra.mxu1 %v4098_v1 }
  0x69   :  { %4103 = vmatprep.subr.bf16.mxu1 %v4102_v12 }
  0x6a   :  { %4165 = vmatpush3.bf16.xpose.msra.mxu0 %v4594_v7 }
  0x6b   :  { %4167 = vmatprep.subr.bf16.mxu0 %v4620_v26 }
  0x70   :  { %4105 = vmatpush3.bf16.xpose.msra.mxu1 %v4102_v12  ;;  %v1337_v12 = vsel %vm815_vm1, %v34_v11, 0 }
  0x71   :  { %4107 = vmatprep.subr.bf16.mxu1 %v4106_v34  ;;  %v1409_v24 = vand.u32 4294901760, %v1337_v12 }
  0x72   :  { %4169 = vmatpush3.bf16.xpose.msra.mxu0 %v4620_v26 }
  0x73   :  { %4171 = vmatprep.subr.bf16.mxu0 %v4646_v53  ;;  %v1410_v22 = vsub.f32 %v1337_v12, %v1409_v24 }
  0x75   :  { %v1411_v23 = vand.u32 4294901760, %v1410_v22 }
  0x77   :  { %v1412_v32 = vsub.f32 %v1410_v22, %v1411_v23 }
  0x78   :  { %4109 = vmatpush3.bf16.xpose.msra.mxu1 %v4106_v34 }
  0x79   :  { %4111 = vmatprep.subr.bf16.mxu1 %v4110_v62  ;;  %v1413_v34 = vand.u32 4294901760, %v1412_v32 }
  0x7a   :  { %4173 = vmatpush3.bf16.xpose.msra.mxu0 %v4646_v53 }
  0x7b   :  { %4175 = vmatprep.subr.bf16.mxu0 %v4668_v10 }
  0x80   :  { %4113 = vmatpush3.bf16.xpose.msra.mxu1 %v4110_v62  ;;  %v1420_v62 = vsub.f32 %v1340_v38, %v1419_v61  ;;  %v38_v38 = vld [vmem:[%s4882_s1 + $0x40] sm:$0xff] }
  0x82   :  { %4177 = vmatpush3.bf16.xpose.msra.mxu0 %v4668_v10 }
  0x83   :  { %4179 = vmatprep.subr.bf16.mxu0 %v4545_v48 }
  0x87   :  { %3698 = vmatmul.mubr.f32.vlgmr.msra.gmra.mrb[0].mxu1 %v4670_v13 }
  0x89   :  { %3768 = vmatmul.mubr.f32.vlgmr.msra.gmra.mrb[0].mxu0 %v212_v43 }
  0x8a   :  { %4181 = vmatpush3.bf16.xpose.msra.mxu0 %v4545_v48  ;;  %3802 = vmatprep.mubr.f32.mxu0 %v4527_v40  ;;  %v46_v48 = vld [vmem:[%s4883_s2 + $0x20] sm:$0xff] }
  0x8b   :  { %4183 = vmatprep.subr.bf16.mxu0 %v4562_v57  ;;  %1328 = vperm.xlu0 %4434, %v46_v48  }
  0x8f   :  { %1848 = vperm.xlu0 %4434, %v48_v30  }
  0x92   :  { %4185 = vmatpush3.bf16.xpose.msra.mxu0 %v4562_v57  ;;  %v52_v57 = vld [vmem:[%s4883_s2 + $0x50] sm:$0xff] }
  0x93   :  { %4187 = vmatprep.subr.bf16.mxu0 %v4578_v63  ;;  %2368 = vperm.xlu0 %4434, %v50_v31   ;;  %v1421_v31 = vand.u32 4294901760, %v1420_v62 }
  0x97   :  { %2888 = vperm.xlu0 %4434, %v52_v57  }
  0x9a   :  { %4189 = vmatpush3.bf16.xpose.msra.mxu0 %v4578_v63 }
  0x9b   :  { %4191 = vmatprep.subr.bf16.mxu0 %v4592_v6 }
  0xa2   :  { %4193 = vmatpush3.bf16.xpose.msra.mxu0 %v4592_v6 }
  0xa3   :  { %4195 = vmatprep.subr.bf16.mxu0 %v4612_v15 }
  0xaa   :  { %4197 = vmatpush3.bf16.xpose.msra.mxu0 %v4612_v15 }
  0xab   :  { %4199 = vmatprep.subr.bf16.mxu0 %v4638_v37 }
  0xb2   :  { %4201 = vmatpush3.bf16.xpose.msra.mxu0 %v4638_v37  ;;  %v45_v37 = vld [vmem:[%s4883_s2 + $0x18] sm:$0xff] }
  0xb3   :  { %4203 = vmatprep.subr.bf16.mxu0 %v4662_v5 }
  0xba   :  { %4205 = vmatpush3.bf16.xpose.msra.mxu0 %v4662_v5  ;;  %v49_v5 = vld [vmem:[%s4883_s2 + $0x38] sm:$0xff] }
  0xbb   :  { %4207 = vmatprep.subr.bf16.mxu0 %v4691_v18 }
  0xc2   :  { %4209 = vmatpush3.bf16.xpose.msra.mxu0 %v4691_v18  ;;  %v57_v35 = vpop.permute.xlu0 %56 }
  0xc3   :  { %4211 = vmatprep.subr.bf16.mxu0 %v4481_v16 }
  0xc6   :  { %v62_v43 = vpop.permute.xlu0 %61 }
  0xc9   :  { %3803 = vmatmul.mubr.f32.vlgmr.msra.gmra.mrb[0].mxu0 %v4670_v13 }
  0xca   :  { %4213 = vmatpush3.bf16.xpose.msra.mxu0 %v4481_v16  ;;  %3837 = vmatprep.mubr.f32.mxu0 %v4527_v40 }
  0xcb   :  { %4215 = vmatprep.subr.bf16.mxu0 %v4489_v20 }
  0xd2   :  { %4217 = vmatpush3.bf16.xpose.msra.mxu0 %v4489_v20 }
  0xd3   :  { %4219 = vmatprep.subr.bf16.mxu0 %v4515_v33 }
  0xda   :  { %4221 = vmatpush3.bf16.xpose.msra.mxu0 %v4515_v33  ;;  %v32_v33 = vld [vmem:[%s4882_s1 + $0x10] sm:$0xff] }
  0xdb   :  { %4223 = vmatprep.subr.bf16.mxu0 %v4547_v49  ;;  %v817_v40 = vsel %vm815_vm1, %v32_v33, 0 }
  0xe2   :  { %4225 = vmatpush3.bf16.xpose.msra.mxu0 %v4547_v49  ;;  %v4821_v49 = vand.u32 4294901760, %v817_v40 }
  0xe3   :  { %4227 = vmatprep.subr.bf16.mxu0 %v4594_v7 }
  0xe4   :  { %v890_v63 = vsub.f32 %v817_v40, %v4821_v49  ;;  %v1422_v40 = vsub.f32 %v1420_v62, %v1421_v31 }
  0xe6   :  { %v891_v6 = vand.u32 4294901760, %v890_v63 }
  0xea   :  { %4229 = vmatpush3.bf16.xpose.msra.mxu0 %v4594_v7  ;;  %v892_v7 = vsub.f32 %v890_v63, %v891_v6 }
  0xeb   :  { %4231 = vmatprep.subr.bf16.mxu0 %v4620_v26 }
  0xec   :  { %v893_v15 = vand.u32 4294901760, %v892_v7 }
  0xee   :  { %3844 = vmatprep.mubr.f32.mxu1 %v893_v15 }
  0xf2   :  { %4233 = vmatpush3.bf16.xpose.msra.mxu0 %v4620_v26  ;;  %v44_v26 = vld [vmem:[%s4883_s2 + $0x10] sm:$0xff] }
  0xf3   :  { %4235 = vmatprep.subr.bf16.mxu0 %v4646_v53  ;;  %807 = vperm.xlu1 %4435, %v44_v26   ;;  %v1423_v26 = vand.u32 4294901760, %v1422_v40 }
  0xf7   :  { %812 = vperm.xlu1 %4435, %v45_v37  }
  0xfa   :  { %4237 = vmatpush3.bf16.xpose.msra.mxu0 %v4646_v53  ;;  %v47_v53 = vld [vmem:[%s4883_s2 + $0x28] sm:$0xff] }
  0xfb   :  { %4239 = vmatprep.subr.bf16.mxu0 %v4668_v10  ;;  %1333 = vperm.xlu1 %4435, %v47_v53  }
  0xff   :  { %1853 = vperm.xlu1 %4435, %v49_v5  }
 0x102   :  { %4241 = vmatpush3.bf16.xpose.msra.mxu0 %v4668_v10  ;;  %v51_v10 = vld [vmem:[%s4883_s2 + $0x48] sm:$0xff] }
 0x103   :  { %2373 = vperm.xlu1 %4435, %v51_v10  }
 0x109   :  { %3838 = vmatmul.mubr.f32.vlgmr.msra.gmra.mrb[0].mxu0 %v4670_v13  ;;  %v33_v13 = vld [vmem:[%s4882_s1 + $0x18] sm:$0xff] }
 0x10a   :  { %v820_v17 = vsel %vm815_vm1, %v33_v13, 0 }
 0x10b   :  { %v899_v18 = vand.u32 4294901760, %v820_v17 }
 0x10d   :  { %v900_v44 = vsub.f32 %v820_v17, %v899_v18 }
 0x10f   :  { %v901_v60 = vand.u32 4294901760, %v900_v44 }
 0x111   :  { %v902_v28 = vsub.f32 %v900_v44, %v901_v60 }
 0x113   :  { %v903_v50 = vand.u32 4294901760, %v902_v28 }
 0x15a   :  { %v3699_v16 = vpop.f32.mrb[0].mxu1 }
 0x15b   :  { %v367_v20 = vpop.f32.mrb[1].mxu1  ;;  %v4362_v36 = vadd.f32 %v3699_v16, %v62_v43 }
 0x15c   :  { %v4364_v45 = vadd.f32 %v367_v20, %v57_v35 }
 0x172   :  { %v808_v39 = vpop.permute.xlu1 %807 }
 0x176   :  { %v813_v8 = vpop.permute.xlu1 %812 }
 0x1dc   :  { %v3839_v46 = vpop.f32.mrb[0].mxu0 }
 0x1dd   :  { %v4363_v54 = vadd.f32 %v4362_v36, %v3839_v46  ;;  %v793_v55 = vpop.f32.mrb[1].mxu0 }
 0x1de   :  { %v4365_v56 = vadd.f32 %v4364_v45, %v793_v55  ;;  %v37_v55 = vld [vmem:[%s4882_s1 + $0x38] sm:$0xff] }
 0x1df   :  { %v804_v19 = vmax.f32 %v4363_v54, 0.0 }
 0x1e0   :  { %v803_v21 = vmax.f32 %v4365_v56, 0.0  ;;  %v1860_v56 = vsel %vm815_vm1, %v37_v55, 0 }
 0x1e1   :  { %v826_v51 = vand.u32 4294901760, %v804_v19 }
 0x1e2   :  { %v823_v52 = vand.u32 4294901760, %v803_v21 }
 0x1e3   :  { %v918_v29 = vsub.f32 %v804_v19, %v826_v51 }
 0x1e4   :  { %v4242_v58 = vpack.c.bf16 %v826_v51, %v823_v52  ;;  %v911_v59 = vsub.f32 %v803_v21, %v823_v52  ;;  %v1334_v21 = vpop.permute.xlu1 %1333  ;;  %v1329_v52 = vpop.permute.xlu0 %1328 }
 0x1e5   :  { %v919_v4 = vand.u32 4294901760, %v918_v29 }
 0x1e6   :  { %v912_v47 = vand.u32 4294901760, %v911_v59  ;;  %4243 = vmatprep.subr.bf16.mxu1 %v4242_v58  ;;  %v4250_v41 = vpack.c.bf16 %v918_v29, %v911_v59 }
 0x1e7   :  { %4245 = vmatpush3.bf16.msra.mxu1 %v4242_v58  ;;  %v920_v42 = vsub.f32 %v918_v29, %v919_v4 }
 0x1e8   :  { %v913_v0 = vsub.f32 %v911_v59, %v912_v47  ;;  %v4258_v1 = vpack.c.bf16 %v919_v4, %v912_v47 }
 0x1e9   :  { %v921_v14 = vand.u32 4294901760, %v920_v42 }
 0x1ea   :  { %3845 = vmatmul.mubr.f32.vlgmr.msra.gmra.mrb[2].mxu1 %v903_v50  ;;  %v914_v2 = vand.u32 4294901760, %v913_v0 }
 0x1eb   :  { %3851 = vmatprep.mubr.f32.mxu1 %v4821_v49 }
 0x1ec   :  { %v4246_v3 = vpack.c.bf16 %v921_v14, %v914_v2 }
 0x1ee   :  { %4247 = vmatprep.subr.bf16.mxu1 %v4246_v3 }
 0x1ef   :  { %4249 = vmatpush3.bf16.msra.mxu1 %v4246_v3 }
 0x1f0   :  { %4251 = vmatprep.subr.bf16.mxu1 %v4250_v41 }
 0x1f2   :  { %3852 = vmatmul.mubr.f32.vlgmr.msra.gmra.mrb[2].mxu1 %v899_v18 }
 0x1f3   :  { %4253 = vmatpush3.bf16.msra.mxu1 %v4250_v41  ;;  %3858 = vmatprep.mubr.f32.mxu1 %v890_v63 }
 0x1f4   :  { %4255 = vmatprep.subr.bf16.mxu1 %v4242_v58 }
 0x1fa   :  { %3859 = vmatmul.mubr.f32.vlgmr.msra.gmra.mrb[2].mxu1 %v900_v44 }
 0x1fb   :  { %4257 = vmatpush3.bf16.msra.mxu1 %v4242_v58  ;;  %3865 = vmatprep.mubr.f32.mxu1 %v891_v6 }
 0x1fc   :  { %4259 = vmatprep.subr.bf16.mxu1 %v4258_v1 }
 0x202   :  { %3866 = vmatmul.mubr.f32.vlgmr.msra.gmra.mrb[2].mxu1 %v901_v60  ;;  %v1939_v60 = vand.u32 4294901760, %v1860_v56 }
 0x203   :  { %4261 = vmatpush3.bf16.msra.mxu1 %v4258_v1  ;;  %3872 = vmatprep.mubr.f32.mxu1 %v4821_v49 }
 0x204   :  { %4263 = vmatprep.subr.bf16.mxu1 %v4242_v58  ;;  %v1940_v19 = vsub.f32 %v1860_v56, %v1939_v60  ;;  %v40_v56 = vld [vmem:[%s4882_s1 + $0x50] sm:$0xff] }
 0x206   :  { %v1941_v59 = vand.u32 4294901760, %v1940_v19 }
 0x208   :  { %v1942_v42 = vsub.f32 %v1940_v19, %v1941_v59 }
 0x20a   :  { %3873 = vmatmul.mubr.f32.vlgmr.msra.gmra.mrb[2].mxu1 %v899_v18  ;;  %v1943_v11 = vand.u32 4294901760, %v1942_v42 }
 0x20b   :  { %4265 = vmatpush3.bf16.msra.mxu1 %v4242_v58  ;;  %3879 = vmatprep.mubr.f32.mxu1 %v4821_v49 }
 0x212   :  { %3880 = vmatmul.mubr.f32.vlgmr.msra.gmra.mrb[2].mxu1 %v899_v18  ;;  %v36_v18 = vld [vmem:[%s4882_s1 + $0x30] sm:$0xff] }
 0x213   :  { %3886 = vmatprep.mubr.f32.mxu1 %v1413_v34  ;;  %v1857_v43 = vsel %vm815_vm1, %v36_v18, 0 }
 0x214   :  { %v1929_v44 = vand.u32 4294901760, %v1857_v43 }
 0x216   :  { %v1930_v36 = vsub.f32 %v1857_v43, %v1929_v44 }
 0x218   :  { %v1931_v45 = vand.u32 4294901760, %v1930_v36 }
 0x21a   :  { %v1932_v46 = vsub.f32 %v1930_v36, %v1931_v45 }
 0x21c   :  { %v1933_v54 = vand.u32 4294901760, %v1932_v46 }
 0x2e5   :  { %v3881_v9 = vpop.f32.mrb[2].mxu1 }
 0x2e6   :  { %v4366_v27 = vadd.f32 %v3881_v9, %v813_v8  ;;  %v1314_v48 = vpop.f32.mrb[3].mxu1 }
 0x2e7   :  { %v4367_v30 = vadd.f32 %v1314_v48, %v808_v39  ;;  %v2377_v39 = vsel %vm815_vm1, %v38_v38, 0  ;;  %v39_v48 = vld [vmem:[%s4882_s1 + $0x48] sm:$0xff] }
 0x2e8   :  { %v1325_v57 = vmax.f32 %v4366_v27, 0.0 }
 0x2e9   :  { %v1324_v16 = vmax.f32 %v4367_v30, 0.0  ;;  %v2380_v30 = vsel %vm815_vm1, %v39_v48, 0 }
 0x2ea   :  { %v1346_v20 = vand.u32 4294901760, %v1325_v57 }
 0x2eb   :  { %v1343_v33 = vand.u32 4294901760, %v1324_v16 }
 0x2ec   :  { %v1438_v49 = vsub.f32 %v1325_v57, %v1346_v20 }
 0x2ed   :  { %v4266_v63 = vpack.c.bf16 %v1346_v20, %v1343_v33  ;;  %v1431_v6 = vsub.f32 %v1324_v16, %v1343_v33  ;;  %v1854_v16 = vpop.permute.xlu1 %1853  ;;  %v1849_v33 = vpop.permute.xlu0 %1848 }
 0x2ee   :  { %v1439_v7 = vand.u32 4294901760, %v1438_v49 }
 0x2ef   :  { %v1432_v15 = vand.u32 4294901760, %v1431_v6  ;;  %4267 = vmatprep.subr.bf16.mxu1 %v4266_v63  ;;  %v4274_v37 = vpack.c.bf16 %v1438_v49, %v1431_v6 }
 0x2f0   :  { %4269 = vmatpush3.bf16.msra.mxu1 %v4266_v63  ;;  %v1440_v53 = vsub.f32 %v1438_v49, %v1439_v7 }
 0x2f1   :  { %v1433_v5 = vsub.f32 %v1431_v6, %v1432_v15  ;;  %v4282_v10 = vpack.c.bf16 %v1439_v7, %v1432_v15 }
 0x2f2   :  { %v1441_v13 = vand.u32 4294901760, %v1440_v53 }
 0x2f3   :  { %3887 = vmatmul.mubr.f32.vlgmr.msra.gmra.mrb[4].mxu1 %v1423_v26  ;;  %v1434_v35 = vand.u32 4294901760, %v1433_v5 }
 0x2f4   :  { %3893 = vmatprep.mubr.f32.mxu1 %v1409_v24 }
 0x2f5   :  { %v4270_v17 = vpack.c.bf16 %v1441_v13, %v1434_v35 }
 0x2f7   :  { %4271 = vmatprep.subr.bf16.mxu1 %v4270_v17 }
 0x2f8   :  { %4273 = vmatpush3.bf16.msra.mxu1 %v4270_v17 }
 0x2f9   :  { %4275 = vmatprep.subr.bf16.mxu1 %v4274_v37 }
 0x2fb   :  { %3894 = vmatmul.mubr.f32.vlgmr.msra.gmra.mrb[4].mxu1 %v1419_v61 }
 0x2fc   :  { %4277 = vmatpush3.bf16.msra.mxu1 %v4274_v37  ;;  %3900 = vmatprep.mubr.f32.mxu1 %v1410_v22 }
 0x2fd   :  { %4279 = vmatprep.subr.bf16.mxu1 %v4266_v63 }
 0x303   :  { %3901 = vmatmul.mubr.f32.vlgmr.msra.gmra.mrb[4].mxu1 %v1420_v62 }
 0x304   :  { %4281 = vmatpush3.bf16.msra.mxu1 %v4266_v63  ;;  %3907 = vmatprep.mubr.f32.mxu1 %v1411_v23 }
 0x305   :  { %4283 = vmatprep.subr.bf16.mxu1 %v4282_v10 }
 0x30b   :  { %3908 = vmatmul.mubr.f32.vlgmr.msra.gmra.mrb[4].mxu1 %v1421_v31  ;;  %v2459_v31 = vand.u32 4294901760, %v2380_v30 }
 0x30c   :  { %4285 = vmatpush3.bf16.msra.mxu1 %v4282_v10  ;;  %3914 = vmatprep.mubr.f32.mxu1 %v1409_v24 }
 0x30d   :  { %4287 = vmatprep.subr.bf16.mxu1 %v4266_v63  ;;  %v2460_v57 = vsub.f32 %v2380_v30, %v2459_v31 }
 0x30f   :  { %v2461_v6 = vand.u32 4294901760, %v2460_v57 }
 0x311   :  { %v2462_v53 = vsub.f32 %v2460_v57, %v2461_v6 }
 0x313   :  { %3915 = vmatmul.mubr.f32.vlgmr.msra.gmra.mrb[4].mxu1 %v1419_v61  ;;  %v2463_v18 = vand.u32 4294901760, %v2462_v53 }
 0x314   :  { %4289 = vmatpush3.bf16.msra.mxu1 %v4266_v63  ;;  %3921 = vmatprep.mubr.f32.mxu1 %v1409_v24 }
 0x31b   :  { %3922 = vmatmul.mubr.f32.vlgmr.msra.gmra.mrb[4].mxu1 %v1419_v61  ;;  %v2449_v61 = vand.u32 4294901760, %v2377_v39 }
 0x31c   :  { %3928 = vmatprep.mubr.f32.mxu1 %v1933_v54 }
 0x31d   :  { %v2450_v62 = vsub.f32 %v2377_v39, %v2449_v61 }
 0x31f   :  { %v2451_v8 = vand.u32 4294901760, %v2450_v62 }
 0x321   :  { %v2452_v9 = vsub.f32 %v2450_v62, %v2451_v8 }
 0x323   :  { %v2453_v27 = vand.u32 4294901760, %v2452_v9 }
 0x3ee   :  { %v3923_v51 = vpop.f32.mrb[4].mxu1 }
 0x3ef   :  { %v4368_v28 = vadd.f32 %v3923_v51, %v1334_v21  ;;  %v1834_v29 = vpop.f32.mrb[5].mxu1 }
 0x3f0   :  { %v4369_v58 = vadd.f32 %v1834_v29, %v1329_v52  ;;  %v41_v29 = vld [vmem:[%s4882_s1 + $0x58] sm:$0xff] }
 0x3f1   :  { %v1845_v4 = vmax.f32 %v4368_v28, 0.0 }
 0x3f2   :  { %v1844_v47 = vmax.f32 %v4369_v58, 0.0  ;;  %v2899_v58 = vsel %vm815_vm1, %v41_v29, 0 }
 0x3f3   :  { %v1866_v50 = vand.u32 4294901760, %v1845_v4 }
 0x3f4   :  { %v1863_v41 = vand.u32 4294901760, %v1844_v47 }
 0x3f5   :  { %v1958_v0 = vsub.f32 %v1845_v4, %v1866_v50 }
 0x3f6   :  { %v4290_v1 = vpack.c.bf16 %v1866_v50, %v1863_v41  ;;  %v1951_v14 = vsub.f32 %v1844_v47, %v1863_v41  ;;  %v2374_v47 = vpop.permute.xlu1 %2373  ;;  %v2369_v41 = vpop.permute.xlu0 %2368 }
 0x3f7   :  { %v1959_v2 = vand.u32 4294901760, %v1958_v0 }
 0x3f8   :  { %v1952_v3 = vand.u32 4294901760, %v1951_v14  ;;  %4291 = vmatprep.subr.bf16.mxu1 %v4290_v1  ;;  %v4298_v12 = vpack.c.bf16 %v1958_v0, %v1951_v14 }
 0x3f9   :  { %4293 = vmatpush3.bf16.msra.mxu1 %v4290_v1  ;;  %v1960_v24 = vsub.f32 %v1958_v0, %v1959_v2 }
 0x3fa   :  { %v1953_v22 = vsub.f32 %v1951_v14, %v1952_v3  ;;  %v4306_v23 = vpack.c.bf16 %v1959_v2, %v1952_v3 }
 0x3fb   :  { %v1961_v32 = vand.u32 4294901760, %v1960_v24 }
 0x3fc   :  { %3929 = vmatmul.mubr.f32.vlgmr.msra.gmra.mrb[6].mxu1 %v1943_v11  ;;  %v1954_v34 = vand.u32 4294901760, %v1953_v22 }
 0x3fd   :  { %3935 = vmatprep.mubr.f32.mxu1 %v1929_v44 }
 0x3fe   :  { %v4294_v25 = vpack.c.bf16 %v1961_v32, %v1954_v34 }
 0x400   :  { %4295 = vmatprep.subr.bf16.mxu1 %v4294_v25 }
 0x401   :  { %4297 = vmatpush3.bf16.msra.mxu1 %v4294_v25 }
 0x402   :  { %4299 = vmatprep.subr.bf16.mxu1 %v4298_v12 }
 0x404   :  { %3936 = vmatmul.mubr.f32.vlgmr.msra.gmra.mrb[6].mxu1 %v1939_v60 }
 0x405   :  { %4301 = vmatpush3.bf16.msra.mxu1 %v4298_v12  ;;  %3942 = vmatprep.mubr.f32.mxu1 %v1930_v36 }
 0x406   :  { %4303 = vmatprep.subr.bf16.mxu1 %v4290_v1 }
 0x40c   :  { %3943 = vmatmul.mubr.f32.vlgmr.msra.gmra.mrb[6].mxu1 %v1940_v19 }
 0x40d   :  { %4305 = vmatpush3.bf16.msra.mxu1 %v4290_v1  ;;  %3949 = vmatprep.mubr.f32.mxu1 %v1931_v45 }
 0x40e   :  { %4307 = vmatprep.subr.bf16.mxu1 %v4306_v23 }
 0x414   :  { %3950 = vmatmul.mubr.f32.vlgmr.msra.gmra.mrb[6].mxu1 %v1941_v59  ;;  %v2978_v59 = vand.u32 4294901760, %v2899_v58 }
 0x415   :  { %4309 = vmatpush3.bf16.msra.mxu1 %v4306_v23  ;;  %3956 = vmatprep.mubr.f32.mxu1 %v1929_v44 }
 0x416   :  { %4311 = vmatprep.subr.bf16.mxu1 %v4290_v1  ;;  %v2979_v4 = vsub.f32 %v2899_v58, %v2978_v59 }
 0x418   :  { %v2980_v14 = vand.u32 4294901760, %v2979_v4 }
 0x41a   :  { %v2981_v24 = vsub.f32 %v2979_v4, %v2980_v14 }
 0x41c   :  { %3957 = vmatmul.mubr.f32.vlgmr.msra.gmra.mrb[6].mxu1 %v1939_v60  ;;  %v2982_v38 = vand.u32 4294901760, %v2981_v24 }
 0x41d   :  { %4313 = vmatpush3.bf16.msra.mxu1 %v4290_v1  ;;  %3963 = vmatprep.mubr.f32.mxu1 %v1929_v44 }
 0x424   :  { %3964 = vmatmul.mubr.f32.vlgmr.msra.gmra.mrb[6].mxu1 %v1939_v60  ;;  %v2896_v60 = vsel %vm815_vm1, %v40_v56, 0 }
 0x425   :  { %3970 = vmatprep.mubr.f32.mxu1 %v2453_v27  ;;  %v2968_v19 = vand.u32 4294901760, %v2896_v60 }
 0x427   :  { %v2969_v21 = vsub.f32 %v2896_v60, %v2968_v19 }
 0x429   :  { %v2970_v51 = vand.u32 4294901760, %v2969_v21 }
 0x42b   :  { %v2971_v52 = vsub.f32 %v2969_v21, %v2970_v51 }
 0x42d   :  { %v2972_v28 = vand.u32 4294901760, %v2971_v52 }
 0x4f7   :  { %v3965_v20 = vpop.f32.mrb[6].mxu1 }
 0x4f8   :  { %v4370_v40 = vadd.f32 %v3965_v20, %v1854_v16  ;;  %v2354_v49 = vpop.f32.mrb[7].mxu1 }
 0x4f9   :  { %v4371_v63 = vadd.f32 %v2354_v49, %v1849_v33 }
 0x4fa   :  { %v2365_v7 = vmax.f32 %v4370_v40, 0.0 }
 0x4fb   :  { %v2364_v15 = vmax.f32 %v4371_v63, 0.0 }
 0x4fc   :  { %v2386_v26 = vand.u32 4294901760, %v2365_v7 }
 0x4fd   :  { %v2383_v37 = vand.u32 4294901760, %v2364_v15 }
 0x4fe   :  { %v2478_v5 = vsub.f32 %v2365_v7, %v2386_v26 }
 0x4ff   :  { %v4314_v10 = vpack.c.bf16 %v2386_v26, %v2383_v37  ;;  %v2471_v13 = vsub.f32 %v2364_v15, %v2383_v37 }
 0x500   :  { %v2479_v35 = vand.u32 4294901760, %v2478_v5 }
 0x501   :  { %v2472_v17 = vand.u32 4294901760, %v2471_v13  ;;  %4315 = vmatprep.subr.bf16.mxu1 %v4314_v10  ;;  %v4322_v43 = vpack.c.bf16 %v2478_v5, %v2471_v13 }
 0x502   :  { %4317 = vmatpush3.bf16.msra.mxu1 %v4314_v10  ;;  %v2480_v44 = vsub.f32 %v2478_v5, %v2479_v35 }
 0x503   :  { %v2473_v36 = vsub.f32 %v2471_v13, %v2472_v17  ;;  %v4330_v45 = vpack.c.bf16 %v2479_v35, %v2472_v17 }
 0x504   :  { %v2481_v46 = vand.u32 4294901760, %v2480_v44 }
 0x505   :  { %3971 = vmatmul.mubr.f32.vlgmr.msra.gmra.mrb[8].mxu1 %v2463_v18  ;;  %v2474_v54 = vand.u32 4294901760, %v2473_v36 }
 0x506   :  { %3977 = vmatprep.mubr.f32.mxu1 %v2449_v61 }
 0x507   :  { %v4318_v55 = vpack.c.bf16 %v2481_v46, %v2474_v54 }
 0x509   :  { %4319 = vmatprep.subr.bf16.mxu1 %v4318_v55 }
 0x50a   :  { %4321 = vmatpush3.bf16.msra.mxu1 %v4318_v55 }
 0x50b   :  { %4323 = vmatprep.subr.bf16.mxu1 %v4322_v43 }
 0x50d   :  { %3978 = vmatmul.mubr.f32.vlgmr.msra.gmra.mrb[8].mxu1 %v2459_v31 }
 0x50e   :  { %4325 = vmatpush3.bf16.msra.mxu1 %v4322_v43  ;;  %3984 = vmatprep.mubr.f32.mxu1 %v2450_v62 }
 0x50f   :  { %4327 = vmatprep.subr.bf16.mxu1 %v4314_v10 }
 0x515   :  { %3985 = vmatmul.mubr.f32.vlgmr.msra.gmra.mrb[8].mxu1 %v2460_v57 }
 0x516   :  { %4329 = vmatpush3.bf16.msra.mxu1 %v4314_v10  ;;  %3991 = vmatprep.mubr.f32.mxu1 %v2451_v8 }
 0x517   :  { %4331 = vmatprep.subr.bf16.mxu1 %v4330_v45 }
 0x51d   :  { %3992 = vmatmul.mubr.f32.vlgmr.msra.gmra.mrb[8].mxu1 %v2461_v6 }
 0x51e   :  { %4333 = vmatpush3.bf16.msra.mxu1 %v4330_v45  ;;  %3998 = vmatprep.mubr.f32.mxu1 %v2449_v61 }
 0x51f   :  { %4335 = vmatprep.subr.bf16.mxu1 %v4314_v10 }
 0x525   :  { %3999 = vmatmul.mubr.f32.vlgmr.msra.gmra.mrb[8].mxu1 %v2459_v31 }
 0x526   :  { %4337 = vmatpush3.bf16.msra.mxu1 %v4314_v10  ;;  %4005 = vmatprep.mubr.f32.mxu1 %v2449_v61 }
 0x52d   :  { %4006 = vmatmul.mubr.f32.vlgmr.msra.gmra.mrb[8].mxu1 %v2459_v31  ;;  %v2889_v31 = vpop.permute.xlu0 %2888 }
 0x52e   :  { %4012 = vmatprep.mubr.f32.mxu1 %v2972_v28 }
 0x600   :  { %v4007_v50 = vpop.f32.mrb[8].mxu1 }
 0x601   :  { %v4372_v42 = vadd.f32 %v4007_v50, %v2374_v47  ;;  %v2874_v0 = vpop.f32.mrb[9].mxu1 }
 0x602   :  { %v4373_v1 = vadd.f32 %v2874_v0, %v2369_v41 }
 0x603   :  { %v2885_v2 = vmax.f32 %v4372_v42, 0.0 }
 0x604   :  { %v2884_v3 = vmax.f32 %v4373_v1, 0.0 }
 0x605   :  { %v2905_v11 = vand.u32 4294901760, %v2885_v2 }
 0x606   :  { %v2902_v12 = vand.u32 4294901760, %v2884_v3 }
 0x607   :  { %v2996_v22 = vsub.f32 %v2885_v2, %v2905_v11 }
 0x608   :  { %v4338_v23 = vpack.c.bf16 %v2905_v11, %v2902_v12  ;;  %v2989_v32 = vsub.f32 %v2884_v3, %v2902_v12 }
 0x609   :  { %v2997_v34 = vand.u32 4294901760, %v2996_v22 }
 0x60a   :  { %v2990_v25 = vand.u32 4294901760, %v2989_v32  ;;  %4339 = vmatprep.subr.bf16.mxu1 %v4338_v23  ;;  %v4346_v39 = vpack.c.bf16 %v2996_v22, %v2989_v32 }
 0x60b   :  { %4341 = vmatpush3.bf16.msra.mxu1 %v4338_v23  ;;  %v2998_v61 = vsub.f32 %v2996_v22, %v2997_v34 }
 0x60c   :  { %v2991_v62 = vsub.f32 %v2989_v32, %v2990_v25  ;;  %v4354_v8 = vpack.c.bf16 %v2997_v34, %v2990_v25 }
 0x60d   :  { %v2999_v9 = vand.u32 4294901760, %v2998_v61 }
 0x60e   :  { %4013 = vmatmul.mubr.f32.vlgmr.msra.gmra.mrb[10].mxu1 %v2982_v38  ;;  %v2992_v27 = vand.u32 4294901760, %v2991_v62 }
 0x60f   :  { %4019 = vmatprep.mubr.f32.mxu1 %v2968_v19 }
 0x610   :  { %v4342_v48 = vpack.c.bf16 %v2999_v9, %v2992_v27 }
 0x612   :  { %4343 = vmatprep.subr.bf16.mxu1 %v4342_v48 }
 0x613   :  { %4345 = vmatpush3.bf16.msra.mxu1 %v4342_v48 }
 0x614   :  { %4347 = vmatprep.subr.bf16.mxu1 %v4346_v39 }
 0x616   :  { %4020 = vmatmul.mubr.f32.vlgmr.msra.gmra.mrb[10].mxu1 %v2978_v59 }
 0x617   :  { %4349 = vmatpush3.bf16.msra.mxu1 %v4346_v39  ;;  %4026 = vmatprep.mubr.f32.mxu1 %v2969_v21 }
 0x618   :  { %4351 = vmatprep.subr.bf16.mxu1 %v4338_v23 }
 0x61e   :  { %4027 = vmatmul.mubr.f32.vlgmr.msra.gmra.mrb[10].mxu1 %v2979_v4 }
 0x61f   :  { %4353 = vmatpush3.bf16.msra.mxu1 %v4338_v23  ;;  %4033 = vmatprep.mubr.f32.mxu1 %v2970_v51 }
 0x620   :  { %4355 = vmatprep.subr.bf16.mxu1 %v4354_v8 }
 0x626   :  { %4034 = vmatmul.mubr.f32.vlgmr.msra.gmra.mrb[10].mxu1 %v2980_v14 }
 0x627   :  { %4357 = vmatpush3.bf16.msra.mxu1 %v4354_v8  ;;  %4040 = vmatprep.mubr.f32.mxu1 %v2968_v19 }
 0x628   :  { %4359 = vmatprep.subr.bf16.mxu1 %v4338_v23 }
 0x62e   :  { %4041 = vmatmul.mubr.f32.vlgmr.msra.gmra.mrb[10].mxu1 %v2978_v59 }
 0x62f   :  { %4361 = vmatpush3.bf16.msra.mxu1 %v4338_v23  ;;  %4047 = vmatprep.mubr.f32.mxu1 %v2968_v19 }
 0x636   :  { %4048 = vmatmul.mubr.f32.vlgmr.msra.gmra.mrb[10].mxu1 %v2978_v59 }
 0x709   :  { %v4049_v30 = vpop.f32.mrb[10].mxu1 }
 0x70a   :  { %v3388_v57 = vpop.f32.mrb[11].mxu1 }
 0x70b   :  { %v4374_v16 = vadd.f32 %v3388_v57, %v2889_v31 }
 0x70d   :  { %3397 = vst [vmem:[%s4884_s3] sm:$0x3f] %v4374_v16 }

</bundles_post_ra>
